<compile_context>
chip_gen: v7x
topology: tpu7x:2x2x1
jax: 0.10.0
libtpu: 0.0.40
codegen_flags: <defaults>
</compile_context>

<pallas_src>
import functools

import jax
import jax.numpy as jnp
from jax.experimental import pallas as pl
from jax.experimental.pallas import tpu as pltpu


def _round_up(n, m):
    return ((n + m - 1) // m) * m


def _actor_kernel(x_ref, w1_ref, b1_ref, w2_ref, b2_ref, w3_ref, b3_ref,
                  out_ref, *, action_type, action_size):
    """One TB-row batch tile; all weights are VMEM-resident padded blocks."""
    x = x_ref[...]

    # FC1 + ReLU  (MXU in stored dtype, f32 accumulate, f32 elementwise)
    h1 = jnp.dot(x, w1_ref[...], preferred_element_type=jnp.float32)
    h1 = jnp.maximum(h1 + b1_ref[...], 0.0)

    # FC2 + ReLU
    h2 = jnp.dot(h1.astype(w2_ref.dtype), w2_ref[...],
                 preferred_element_type=jnp.float32)
    h2 = jnp.maximum(h2 + b2_ref[...], 0.0)

    # FC3 + head nonlinearity
    logits = jnp.dot(h2.astype(w3_ref.dtype), w3_ref[...],
                     preferred_element_type=jnp.float32)
    logits = logits + b3_ref[...]

    if action_type == "continuous":
        act = jnp.tanh(logits)
    else:
        # Softmax over the REAL action columns only (output lanes are padded
        # to a multiple of 128 for lane-dense stores).
        col = jax.lax.broadcasted_iota(jnp.int32, logits.shape, dimension=1)
        valid = col < action_size
        masked = jnp.where(valid, logits, jnp.float32(-1e30))
        m = jnp.max(masked, axis=-1, keepdims=True)
        e = jnp.where(valid, jnp.exp(masked - m), 0.0)
        denom = jnp.sum(e, axis=-1, keepdims=True)
        # exact reciprocal keeps the tight f32 tolerance; cost is negligible
        act = e * pl.reciprocal(denom, approx=False)

    out_ref[...] = act.astype(out_ref.dtype)


def actor_forward(x, params, action_type="continuous", *, batch_tile=256,
                  io_dtype=jnp.float32):
    """x: [B, state_size]. params: dict of w1,b1,w2,b2,w3,b3 (unpadded)."""
    w1, b1 = params["w1"], params["b1"]
    w2, b2 = params["w2"], params["b2"]
    w3, b3 = params["w3"], params["b3"]

    B, state_size = x.shape
    h1_dim, h2_dim = w1.shape[1], w2.shape[1]
    action_size = w3.shape[1]

    # Lane-dense padded widths (hidden + output -> multiples of 128).
    H1 = _round_up(h1_dim, 128)
    H2 = _round_up(h2_dim, 128)
    A = _round_up(action_size, 128)

    def pad2(a, rows, cols):
        return jnp.pad(a, ((0, rows - a.shape[0]), (0, cols - a.shape[1])))

    # NOTE: for production, pad the weights once at init instead of per call.
    w1p = pad2(w1, state_size, H1).astype(io_dtype)
    w2p = pad2(w2, H1, H2).astype(io_dtype)
    w3p = pad2(w3, H2, A).astype(io_dtype)
    b1p = pad2(b1, 1, H1).astype(jnp.float32)
    b2p = pad2(b2, 1, H2).astype(jnp.float32)
    b3p = pad2(b3, 1, A).astype(jnp.float32)

    # Batch tile: multiple of 8 (f32 sublane), up to `batch_tile` rows.
    TB = batch_tile if B >= batch_tile else max(8, _round_up(B, 8))
    Bp = _round_up(B, TB)
    xp = x.astype(io_dtype)
    if Bp != B:
        xp = jnp.pad(xp, ((0, Bp - B), (0, 0)))

    kernel = functools.partial(_actor_kernel, action_type=action_type,
                               action_size=action_size)

    def const(a):  # full-extent, VMEM-resident across all grid steps
        return pl.BlockSpec(a.shape, lambda i: (0,) * a.ndim)

    out = pl.pallas_call(
        kernel,
        out_shape=jax.ShapeDtypeStruct((Bp, A), io_dtype),
        grid=(Bp // TB,),
        in_specs=[pl.BlockSpec((TB, state_size), lambda i: (i, 0)),
                  const(w1p), const(b1p), const(w2p), const(b2p),
                  const(w3p), const(b3p)],
        out_specs=pl.BlockSpec((TB, A), lambda i: (i, 0)),
        compiler_params=pltpu.CompilerParams(
            dimension_semantics=("parallel",)),
    )(xp, w1p, b1p, w2p, b2p, w3p, b3p)

    return out[:B, :action_size].astype(jnp.float32)


def init_actor_params(key, state_size, action_size, actor_layers=(64, 64),
                      low=-0.03, high=0.03):
    """Matches initialize_weights: every parameter ~ U(low, high)."""
    h1, h2 = actor_layers
    ks = jax.random.split(key, 6)
    u = lambda k, shape: jax.random.uniform(k, shape, jnp.float32, low, high)
    return {
        "w1": u(ks[0], (state_size, h1)),
        "b1": u(ks[1], (1, h1)),
        "w2": u(ks[2], (h1, h2)),
        "b2": u(ks[3], (1, h2)),
        "w3": u(ks[4], (h2, action_size)),
        "b3": u(ks[5], (1, action_size)),
    }


def _reference_forward(x, params, action_type):
    h1 = jnp.maximum(x @ params["w1"] + params["b1"], 0.0)
    h2 = jnp.maximum(h1 @ params["w2"] + params["b2"], 0.0)
    logits = h2 @ params["w3"] + params["b3"]
    if action_type == "continuous":
        return jnp.tanh(logits)
    return jax.nn.softmax(logits, axis=-1)


if __name__ == "__main__":
    key = jax.random.PRNGKey(0)
    k_x, k_x2, k_p = jax.random.split(key, 3)

    state_size = 32
    action_size = 8
    actor_layers = (64, 64)   # stands in for Configurations.ACTOR_LAYERS
    params = init_actor_params(k_p, state_size, action_size, actor_layers)

    ok = True

    # Small batch, f32 I/O: tight tolerance vs. reference.
    x_small = jax.random.normal(k_x, (8, state_size), dtype=jnp.float32)
    for action_type in ("continuous", "discrete"):
        out = jax.block_until_ready(
            actor_forward(x_small, params, action_type=action_type))
        ref = _reference_forward(x_small, params, action_type)
        ok &= bool(jnp.allclose(out, ref, atol=1e-5, rtol=1e-5))

    # Larger batch exercising a multi-step grid + batch padding (f32 I/O).
    x_big = jax.random.normal(k_x2, (260, state_size), dtype=jnp.float32)
    for action_type in ("continuous", "discrete"):
        out = jax.block_until_ready(
            actor_forward(x_big, params, action_type=action_type))
        ref = _reference_forward(x_big, params, action_type)
        ok &= bool(jnp.allclose(out, ref, atol=1e-5, rtol=1e-5))

    # bf16 I/O path (HBM-bandwidth saving on v6e/v7x): looser tolerance.
    for action_type in ("continuous", "discrete"):
        out = jax.block_until_ready(
            actor_forward(x_small, params, action_type=action_type,
                          io_dtype=jnp.bfloat16))
        ref = _reference_forward(x_small, params, action_type)
        ok &= bool(jnp.allclose(out, ref, atol=5e-2, rtol=5e-2))

    if ok:
        print("KERNEL_OK")
</pallas_src>

<mosaic_0001>
module attributes {stable_mosaic.version = 11 : i64} {
  func.func @_actor_kernel(%arg0: i32, %arg1: memref<8x32xf32, #tpu.memory_space<vmem>>, %arg2: memref<32x128xf32, #tpu.memory_space<vmem>>, %arg3: memref<1x128xf32, #tpu.memory_space<vmem>>, %arg4: memref<128x128xf32, #tpu.memory_space<vmem>>, %arg5: memref<1x128xf32, #tpu.memory_space<vmem>>, %arg6: memref<128x128xf32, #tpu.memory_space<vmem>>, %arg7: memref<1x128xf32, #tpu.memory_space<vmem>>, %arg8: memref<8x128xf32, #tpu.memory_space<vmem>>) attributes {dimension_semantics = [#tpu.dimension_semantics<parallel>], iteration_bounds = array<i64: 1>, scalar_prefetch = 0 : i64, scratch_operands = 0 : i64, tpu.core_type = #tpu.core_type<tc>, window_params = [{transform_indices = @transform_0, window_bounds = array<i64: 8, 32>}, {pipeline_mode = #tpu.pipeline_mode<synchronous>, transform_indices = @transform_1, window_bounds = array<i64: 32, 128>}, {pipeline_mode = #tpu.pipeline_mode<synchronous>, transform_indices = @transform_2, window_bounds = array<i64: 1, 128>}, {pipeline_mode = #tpu.pipeline_mode<synchronous>, transform_indices = @transform_3, window_bounds = array<i64: 128, 128>}, {pipeline_mode = #tpu.pipeline_mode<synchronous>, transform_indices = @transform_4, window_bounds = array<i64: 1, 128>}, {pipeline_mode = #tpu.pipeline_mode<synchronous>, transform_indices = @transform_5, window_bounds = array<i64: 128, 128>}, {pipeline_mode = #tpu.pipeline_mode<synchronous>, transform_indices = @transform_6, window_bounds = array<i64: 1, 128>}, {transform_indices = @transform_7, window_bounds = array<i64: 8, 128>}]} {
    %c0 = arith.constant 0 : index
    %c0_0 = arith.constant 0 : index
    %0 = vector.load %arg1[%c0, %c0_0] : memref<8x32xf32, #tpu.memory_space<vmem>>, vector<8x32xf32>
    %c0_1 = arith.constant 0 : index
    %c0_2 = arith.constant 0 : index
    %1 = vector.load %arg2[%c0_1, %c0_2] : memref<32x128xf32, #tpu.memory_space<vmem>>, vector<32x128xf32>
    %cst = arith.constant dense<0.000000e+00> : vector<8x128xf32>
    %2 = tpu.matmul %0, %1, %cst {dimension_numbers = #tpu.dot_dimension_numbers<[1], [0], [0], [1], [0, 0, 1, 1], [], []>} : vector<8x32xf32>, vector<32x128xf32>, vector<8x128xf32> -> vector<8x128xf32>
    %c0_3 = arith.constant 0 : index
    %c0_4 = arith.constant 0 : index
    %3 = vector.load %arg3[%c0_3, %c0_4] : memref<1x128xf32, #tpu.memory_space<vmem>>, vector<1x128xf32>
    %4 = vector.broadcast %3 : vector<1x128xf32> to vector<8x128xf32>
    %5 = arith.addf %2, %4 : vector<8x128xf32>
    %cst_5 = arith.constant 0.000000e+00 : f32
    %6 = vector.broadcast %cst_5 : f32 to vector<8x128xf32>
    %7 = arith.maximumf %5, %6 : vector<8x128xf32>
    %c0_6 = arith.constant 0 : index
    %c0_7 = arith.constant 0 : index
    %8 = vector.load %arg4[%c0_6, %c0_7] : memref<128x128xf32, #tpu.memory_space<vmem>>, vector<128x128xf32>
    %cst_8 = arith.constant dense<0.000000e+00> : vector<8x128xf32>
    %9 = tpu.matmul %7, %8, %cst_8 {dimension_numbers = #tpu.dot_dimension_numbers<[1], [0], [0], [1], [0, 0, 1, 1], [], []>} : vector<8x128xf32>, vector<128x128xf32>, vector<8x128xf32> -> vector<8x128xf32>
    %c0_9 = arith.constant 0 : index
    %c0_10 = arith.constant 0 : index
    %10 = vector.load %arg5[%c0_9, %c0_10] : memref<1x128xf32, #tpu.memory_space<vmem>>, vector<1x128xf32>
    %11 = vector.broadcast %10 : vector<1x128xf32> to vector<8x128xf32>
    %12 = arith.addf %9, %11 : vector<8x128xf32>
    %cst_11 = arith.constant 0.000000e+00 : f32
    %13 = vector.broadcast %cst_11 : f32 to vector<8x128xf32>
    %14 = arith.maximumf %12, %13 : vector<8x128xf32>
    %c0_12 = arith.constant 0 : index
    %c0_13 = arith.constant 0 : index
    %15 = vector.load %arg6[%c0_12, %c0_13] : memref<128x128xf32, #tpu.memory_space<vmem>>, vector<128x128xf32>
    %cst_14 = arith.constant dense<0.000000e+00> : vector<8x128xf32>
    %16 = tpu.matmul %14, %15, %cst_14 {dimension_numbers = #tpu.dot_dimension_numbers<[1], [0], [0], [1], [0, 0, 1, 1], [], []>} : vector<8x128xf32>, vector<128x128xf32>, vector<8x128xf32> -> vector<8x128xf32>
    %c0_15 = arith.constant 0 : index
    %c0_16 = arith.constant 0 : index
    %17 = vector.load %arg7[%c0_15, %c0_16] : memref<1x128xf32, #tpu.memory_space<vmem>>, vector<1x128xf32>
    %18 = vector.broadcast %17 : vector<1x128xf32> to vector<8x128xf32>
    %19 = arith.addf %16, %18 : vector<8x128xf32>
    %20 = math.tanh %19 : vector<8x128xf32>
    %c0_17 = arith.constant 0 : index
    %c0_18 = arith.constant 0 : index
    %21 = vector.load %arg8[%c0_17, %c0_18] : memref<8x128xf32, #tpu.memory_space<vmem>>, vector<8x128xf32>
    tpu.vector_store %arg8[%c0_17, %c0_18], %20 {strides = array<i32>} : memref<8x128xf32, #tpu.memory_space<vmem>>, vector<8x128xf32>,
    return
  }
  func.func @transform_0(%arg0: i32) -> (i32, i32) {
    %c0_i32 = arith.constant 0 : i32
    %c0_i32_0 = arith.constant 0 : i32
    return %arg0, %c0_i32 : i32, i32
  }
  func.func @transform_1(%arg0: i32) -> (i32, i32) {
    %c0_i32 = arith.constant 0 : i32
    %c0_i32_0 = arith.constant 0 : i32
    %c0_i32_1 = arith.constant 0 : i32
    return %c0_i32, %c0_i32_0 : i32, i32
  }
  func.func @transform_2(%arg0: i32) -> (i32, i32) {
    %c0_i32 = arith.constant 0 : i32
    %c0_i32_0 = arith.constant 0 : i32
    %c0_i32_1 = arith.constant 0 : i32
    return %c0_i32, %c0_i32_0 : i32, i32
  }
  func.func @transform_3(%arg0: i32) -> (i32, i32) {
    %c0_i32 = arith.constant 0 : i32
    %c0_i32_0 = arith.constant 0 : i32
    %c0_i32_1 = arith.constant 0 : i32
    return %c0_i32, %c0_i32_0 : i32, i32
  }
  func.func @transform_4(%arg0: i32) -> (i32, i32) {
    %c0_i32 = arith.constant 0 : i32
    %c0_i32_0 = arith.constant 0 : i32
    %c0_i32_1 = arith.constant 0 : i32
    return %c0_i32, %c0_i32_0 : i32, i32
  }
  func.func @transform_5(%arg0: i32) -> (i32, i32) {
    %c0_i32 = arith.constant 0 : i32
    %c0_i32_0 = arith.constant 0 : i32
    %c0_i32_1 = arith.constant 0 : i32
    return %c0_i32, %c0_i32_0 : i32, i32
  }
  func.func @transform_6(%arg0: i32) -> (i32, i32) {
    %c0_i32 = arith.constant 0 : i32
    %c0_i32_0 = arith.constant 0 : i32
    %c0_i32_1 = arith.constant 0 : i32
    return %c0_i32, %c0_i32_0 : i32, i32
  }
  func.func @transform_7(%arg0: i32) -> (i32, i32) {
    %c0_i32 = arith.constant 0 : i32
    %c0_i32_0 = arith.constant 0 : i32
    return %arg0, %c0_i32 : i32, i32
  }
}

</mosaic_0001>

<bundles_post_ra>
// kernel: tpu_custom_call.1
= control target key start
LH: loop header
LB: loop body
LE: loop exit
PB: predicated region body
PF: predicated region fallthrough
CT: control target
= control target key end

     0   :  { %12 = vsyncpa [#allocation3], 0  ;;  %s830_s0 = inlined_call_operand.hbm [shape: f32[8,32], index: 0, kind: input, shape index: {}]   ;;  %s831_s1 = inlined_call_operand.hbm [shape: f32[32,128], index: 1, kind: input, shape index: {}]   ;;  %s832_s2 = inlined_call_operand.vmem [shape: f32[1,128], index: 2, kind: input, shape index: {}]   ;;  %s833_s3 = inlined_call_operand.hbm [shape: f32[128,128], index: 3, kind: input, shape index: {}]   ;;  %s834_s4 = inlined_call_operand.vmem [shape: f32[1,128], index: 4, kind: input, shape index: {}]   ;;  %s835_s5 = inlined_call_operand.hbm [shape: f32[128,128], index: 5, kind: input, shape index: {}]   ;;  %s836_s6 = inlined_call_operand.vmem [shape: f32[1,128], index: 6, kind: input, shape index: {}]   ;;  %s837_s7 = inlined_call_operand.hbm [shape: f32[8,128], index: 7, kind: output, shape index: {}]  }
   0x1   :  { %13 = vsyncpa [#allocation6], 0 }
   0x2   :  { %14 = vsyncpa [#allocation9], 0 }
   0x3   :  { %15 = vsyncpa [#allocation4], 0  ;;  %s681_s24 = smov [#allocation5]   ;;  %s563_s28 = scalar_lea.hbm %s831_s1, 512 }
   0x4   :  { %s31_s25 = sshll.u32 %s681_s24, 4  ;;  %p564_p0 = scmp.ne.s32.totalorder %s831_s1, %s563_s28  ;;  %s32_s25 = int_to_ptr.vmem [resolvable:$true] %s31_s25 }
   0x5   :  { %p567_p1 = scmp.lt.u32.totalorder %s563_s28, %s831_s1 }
   0x7   :  { %p569_p2 = pnand %p567_p1, %p564_p0 }
   0x9   :  { %572 = shalt.err (!%p569_p2)
}
   0xa   :  { %s573_s10 = scalar_lea.vmem %s32_s25, 512  ;;  %p578_p4 = scmp.lt.s32.totalorder %s32_s25, %s32_s25 }
   0xb   :  { %p574_p3 = scmp.ne.s32.totalorder %s32_s25, %s573_s10  ;;  %p579_p5 = scmp.lt.s32.totalorder %s573_s10, %s573_s10 }
   0xd   :  { %p580_p6 = por %p579_p5, %p578_p4 }
   0xf   :  { %p581_p7 = pnand %p580_p6, %p574_p3 }
  0x11   :  { %584 = shalt.err (!%p581_p7)
}
  0x12   :  { %s682_s11 = smov 128   ;;  %s683_s12 = smov 8  }
  0x13   :  { %37 = dma.hbm_to_vmem [thread:$0]  %s831_s1, 512, %s32_s25, [#allocation6], %s682_s11, %s682_s11, %s683_s12  }
  0x14   :  { %s684_s15 = smov [#allocation2]   ;;  %s685_s17 = smov [#allocation7]  }
  0x15   :  { %s22_s16 = sshll.u32 %s684_s15, 4  ;;  %s45_s18 = sshll.u32 %s685_s17, 4  ;;  %s23_s16 = int_to_ptr.vmem [resolvable:$true] %s22_s16  ;;  %s46_s18 = int_to_ptr.vmem [resolvable:$true] %s45_s18 }
  0x16   :  { %s585_s21 = scalar_lea.hbm %s830_s0, 128 }
  0x17   :  { %p586_p8 = scmp.ne.s32.totalorder %s830_s0, %s585_s21  ;;  %p589_p9 = scmp.lt.u32.totalorder %s585_s21, %s830_s0 }
  0x19   :  { %p591_p10 = pnand %p589_p9, %p586_p8 }
  0x1b   :  { %594 = shalt.err (!%p591_p10)
}
  0x1c   :  { %s595_s1 = scalar_lea.vmem %s23_s16, 128  ;;  %p600_p12 = scmp.lt.s32.totalorder %s23_s16, %s23_s16 }
  0x1d   :  { %p596_p11 = scmp.ne.s32.totalorder %s23_s16, %s595_s1  ;;  %p601_p13 = scmp.lt.s32.totalorder %s595_s1, %s595_s1 }
  0x1f   :  { %p602_p0 = por %p601_p13, %p600_p12 }
  0x21   :  { %p603_p1 = pnand %p602_p0, %p596_p11 }
  0x23   :  { %606 = shalt.err (!%p603_p1)
}
  0x24   :  { %25 = dma.hbm_to_vmem [thread:$0]  %s830_s0, 128, %s23_s16, [#allocation3]  }
  0x25   :  { %s607_s30 = scalar_lea.hbm %s833_s3, 2048 }
  0x26   :  { %p608_p2 = scmp.ne.s32.totalorder %s833_s3, %s607_s30  ;;  %p611_p3 = scmp.lt.u32.totalorder %s607_s30, %s833_s3 }
  0x28   :  { %p613_p4 = pnand %p611_p3, %p608_p2 }
  0x2a   :  { %616 = shalt.err (!%p613_p4)
}
  0x2b   :  { %s617_s14 = scalar_lea.vmem %s46_s18, 2048  ;;  %p622_p6 = scmp.lt.s32.totalorder %s46_s18, %s46_s18 }
  0x2c   :  { %p618_p5 = scmp.ne.s32.totalorder %s46_s18, %s617_s14  ;;  %p623_p7 = scmp.lt.s32.totalorder %s617_s14, %s617_s14 }
  0x2e   :  { %p624_p8 = por %p623_p7, %p622_p6 }
  0x30   :  { %p625_p9 = pnand %p624_p8, %p618_p5 }
  0x32   :  { %628 = shalt.err (!%p625_p9)
}
  0x33   :  { %51 = dma.hbm_to_vmem [thread:$0]  %s833_s3, 2048, %s46_s18, [#allocation6], %s682_s11, %s682_s11, %s683_s12  }
  0x34   :  { %s686_s16 = smov [#allocation8]   ;;  %s629_s21 = scalar_lea.hbm %s835_s5, 2048 }
  0x35   :  { %s59_s17 = sshll.u32 %s686_s16, 4  ;;  %p630_p10 = scmp.ne.s32.totalorder %s835_s5, %s629_s21  ;;  %s60_s17 = int_to_ptr.vmem [resolvable:$true] %s59_s17 }
  0x36   :  { %p633_p11 = scmp.lt.u32.totalorder %s629_s21, %s835_s5 }
  0x38   :  { %p635_p12 = pnand %p633_p11, %p630_p10 }
  0x3a   :  { %638 = shalt.err (!%p635_p12)
}
  0x3b   :  { %s639_s1 = scalar_lea.vmem %s60_s17, 2048  ;;  %p644_p0 = scmp.lt.s32.totalorder %s60_s17, %s60_s17 }
  0x3c   :  { %p640_p13 = scmp.ne.s32.totalorder %s60_s17, %s639_s1  ;;  %p645_p1 = scmp.lt.s32.totalorder %s639_s1, %s639_s1 }
  0x3e   :  { %p646_p2 = por %p645_p1, %p644_p0 }
  0x40   :  { %p647_p3 = pnand %p646_p2, %p640_p13 }
  0x42   :  { %650 = shalt.err (!%p647_p3)
}
  0x43   :  { %65 = dma.hbm_to_vmem [thread:$0]  %s835_s5, 2048, %s60_s17, [#allocation9], %s682_s11, %s682_s11, %s683_s12  }
  0x44   :  { %673 = dma.done.wait [#allocation3], 128  }
  0x45   :  { %674 = vsyncadd [#allocation3], 4294967168 }
  0x46   :  { %675 = dma.done.wait [#allocation6], 2560  }
  0x47   :  { %676 = vsyncadd [#allocation6], 4294964736 }
  0x48   :  { %677 = dma.done.wait [#allocation9], 2048  }
  0x49   :  { %678 = vsyncadd [#allocation9], 4294965248  ;;  %v687_v0 = vmov 0.0|0.0   ;;  %vm688_vm0 = vmmov 0   ;;  %v689_v1 = vmov 0.0   ;;  %v81_v2 = vld [vmem:[#allocation5] sm:$0xff] }
  0x4a   :  { %497 = vmatprep.subr.bf16.mxu0 %v687_v0  ;;  %424 = vmatprep.mubr.msk.f32.mxu0 %vm688_vm0, %v689_v1  ;;  %v82_v3 = vld [vmem:[#allocation5 + $0x8] sm:$0xff]  ;;  %v83_v4 = vld [vmem:[#allocation5 + $0x10] sm:$0xff]  ;;  %v84_v6 = vld [vmem:[#allocation5 + $0x18] sm:$0xff]  ;;  %vm92_vm1 = vcmask 261120   ;;  %s690_s28 = smov [#allocation10]  }
  0x4b   :  { %503 = vmatprep.subr.bf16.mxu1 %v687_v0  ;;  %459 = vmatprep.mubr.msk.f32.mxu1 %vm688_vm0, %v689_v1  ;;  %v498_v5 = vpack.c.bf16 %v82_v3, %v81_v2  ;;  %v167_v7 = vld [vmem:[#allocation7] sm:$0xff]  ;;  %v168_v8 = vld [vmem:[#allocation7 + $0x8] sm:$0xff]  ;;  %v169_v9 = vld [vmem:[#allocation7 + $0x10] sm:$0xff]  ;;  %v501_v11 = vpack.c.bf16 %v84_v6, %v83_v4  ;;  %s362_s29 = sshll.u32 %s690_s28, 4  ;;  %s363_s29 = int_to_ptr.vmem [resolvable:$true] %s362_s29 }
  0x4c   :  { %v170_v10 = vld [vmem:[#allocation7 + $0x18] sm:$0xff]  ;;  %v504_v12 = vpack.c.bf16 %v168_v8, %v167_v7  ;;  %v171_v14 = vld [vmem:[#allocation7 + $0x20] sm:$0xff]  ;;  %v172_v15 = vld [vmem:[#allocation7 + $0x28] sm:$0xff]  ;;  %s651_s30 = scalar_lea.vmem %s363_s29, 128  ;;  %p656_p5 = scmp.lt.s32.totalorder %s363_s29, %s363_s29 }
  0x4d   :  { %499 = vmatpush3.bf16.msra.mxu0 %v498_v5  ;;  %v507_v13 = vpack.c.bf16 %v170_v10, %v169_v9  ;;  %v80_v16 = vld [vmem:[#allocation2] sm:$0xff]  ;;  %v510_v17 = vpack.c.bf16 %v172_v15, %v171_v14  ;;  %v173_v18 = vld [vmem:[#allocation7 + $0x30] sm:$0xff]  ;;  %v175_v21 = vld [vmem:[#allocation7 + $0x40] sm:$0xff]  ;;  %p652_p4 = scmp.ne.s32.totalorder %s363_s29, %s651_s30  ;;  %p657_p6 = scmp.lt.s32.totalorder %s651_s30, %s651_s30 }
  0x4e   :  { %500 = vmatprep.subr.bf16.mxu0 %v687_v0  ;;  %505 = vmatpush3.bf16.msra.mxu1 %v504_v12  ;;  %v174_v19 = vld [vmem:[#allocation7 + $0x38] sm:$0xff]  ;;  %v176_v22 = vld [vmem:[#allocation7 + $0x48] sm:$0xff]  ;;  %v177_v24 = vld [vmem:[#allocation7 + $0x50] sm:$0xff] }
  0x4f   :  { %506 = vmatprep.subr.bf16.mxu1 %v687_v0  ;;  %v513_v20 = vpack.c.bf16 %v174_v19, %v173_v18  ;;  %v516_v23 = vpack.c.bf16 %v176_v22, %v175_v21  ;;  %v178_v25 = vld [vmem:[#allocation7 + $0x58] sm:$0xff]  ;;  %v179_v27 = vld [vmem:[#allocation7 + $0x60] sm:$0xff]  ;;  %v180_v28 = vld [vmem:[#allocation7 + $0x68] sm:$0xff]  ;;  %p658_p7 = por %p657_p6, %p656_p5 }
  0x50   :  { %v519_v26 = vpack.c.bf16 %v178_v25, %v177_v24  ;;  %v522_v29 = vpack.c.bf16 %v180_v28, %v179_v27  ;;  %v181_v30 = vld [vmem:[#allocation7 + $0x70] sm:$0xff]  ;;  %v182_v31 = vld [vmem:[#allocation7 + $0x78] sm:$0xff]  ;;  %v261_v33 = vld [vmem:[#allocation8] sm:$0xff] }
  0x51   :  { %502 = vmatpush3.bf16.msra.mxu0 %v501_v11  ;;  %v525_v32 = vpack.c.bf16 %v182_v31, %v181_v30  ;;  %v262_v34 = vld [vmem:[#allocation8 + $0x8] sm:$0xff]  ;;  %v263_v35 = vld [vmem:[#allocation8 + $0x10] sm:$0xff]  ;;  %v264_v37 = vld [vmem:[#allocation8 + $0x18] sm:$0xff]  ;;  %p659_p8 = pnand %p658_p7, %p652_p4 }
  0x52   :  { %527 = vmatprep.subr.bf16.mxu0 %v687_v0  ;;  %508 = vmatpush3.bf16.msra.mxu1 %v507_v13  ;;  %v528_v36 = vpack.c.bf16 %v262_v34, %v261_v33  ;;  %v531_v38 = vpack.c.bf16 %v264_v37, %v263_v35  ;;  %v265_v39 = vld [vmem:[#allocation8 + $0x20] sm:$0xff]  ;;  %v266_v40 = vld [vmem:[#allocation8 + $0x28] sm:$0xff]  ;;  %v267_v42 = vld [vmem:[#allocation8 + $0x30] sm:$0xff] }
  0x53   :  { %509 = vmatprep.subr.bf16.mxu1 %v687_v0  ;;  %v534_v41 = vpack.c.bf16 %v266_v40, %v265_v39  ;;  %v268_v43 = vld [vmem:[#allocation8 + $0x38] sm:$0xff]  ;;  %v269_v45 = vld [vmem:[#allocation8 + $0x40] sm:$0xff]  ;;  %v270_v46 = vld [vmem:[#allocation8 + $0x48] sm:$0xff] }
  0x54   :  { %425 = vmatmul.mubr.msk.f32.vlgmr.msra.gmra.mrb[0].mxu0 %vm92_vm1, %v80_v16  ;;  %v537_v44 = vpack.c.bf16 %v268_v43, %v267_v42  ;;  %v540_v47 = vpack.c.bf16 %v270_v46, %v269_v45  ;;  %v271_v48 = vld [vmem:[#allocation8 + $0x50] sm:$0xff]  ;;  %v272_v49 = vld [vmem:[#allocation8 + $0x58] sm:$0xff]  ;;  %v273_v51 = vld [vmem:[#allocation8 + $0x60] sm:$0xff] }
  0x55   :  { %494 = vmatprep.mubr.msk.f32.mxu0 %vm688_vm0, %v689_v1  ;;  %529 = vmatpush3.bf16.msra.mxu0 %v528_v36  ;;  %v543_v50 = vpack.c.bf16 %v272_v49, %v271_v48  ;;  %v274_v52 = vld [vmem:[#allocation8 + $0x68] sm:$0xff]  ;;  %v373_v54 = vld [vmem:[%s832_s2] ss:$0 sm:$0xff]  ;;  %v275_v59 = vld [vmem:[#allocation8 + $0x70] sm:$0xff] }
  0x56   :  { %511 = vmatpush3.bf16.msra.mxu1 %v510_v17  ;;  %530 = vmatprep.subr.bf16.mxu0 %v687_v0  ;;  %v546_v53 = vpack.c.bf16 %v274_v52, %v273_v51  ;;  %v276_v60 = vld [vmem:[#allocation8 + $0x78] sm:$0xff] }
  0x57   :  { %512 = vmatprep.subr.bf16.mxu1 %v687_v0  ;;  %v549_v61 = vpack.c.bf16 %v276_v60, %v275_v59  ;;  %v375_v62 = vld [vmem:[%s834_s4] ss:$0 sm:$0xff] }
  0x58   :  { %v376_v3 = vld [vmem:[%s836_s6] ss:$0 sm:$0xff] }
  0x59   :  { %532 = vmatpush3.bf16.msra.mxu0 %v531_v38 }
  0x5a   :  { %514 = vmatpush3.bf16.msra.mxu1 %v513_v20  ;;  %533 = vmatprep.subr.bf16.mxu0 %v687_v0 }
  0x5b   :  { %515 = vmatprep.subr.bf16.mxu1 %v687_v0 }
  0x5d   :  { %535 = vmatpush3.bf16.msra.mxu0 %v534_v41 }
  0x5e   :  { %517 = vmatpush3.bf16.msra.mxu1 %v516_v23  ;;  %536 = vmatprep.subr.bf16.mxu0 %v687_v0 }
  0x5f   :  { %518 = vmatprep.subr.bf16.mxu1 %v687_v0 }
  0x61   :  { %538 = vmatpush3.bf16.msra.mxu0 %v537_v44 }
  0x62   :  { %520 = vmatpush3.bf16.msra.mxu1 %v519_v26  ;;  %539 = vmatprep.subr.bf16.mxu0 %v687_v0 }
  0x63   :  { %521 = vmatprep.subr.bf16.mxu1 %v687_v0 }
  0x65   :  { %541 = vmatpush3.bf16.msra.mxu0 %v540_v47 }
  0x66   :  { %523 = vmatpush3.bf16.msra.mxu1 %v522_v29  ;;  %542 = vmatprep.subr.bf16.mxu0 %v687_v0 }
  0x67   :  { %524 = vmatprep.subr.bf16.mxu1 %v687_v0 }
  0x69   :  { %544 = vmatpush3.bf16.msra.mxu0 %v543_v50 }
  0x6a   :  { %526 = vmatpush3.bf16.msra.mxu1 %v525_v32  ;;  %545 = vmatprep.subr.bf16.mxu0 %v687_v0 }
  0x6d   :  { %547 = vmatpush3.bf16.msra.mxu0 %v546_v53 }
  0x6e   :  { %548 = vmatprep.subr.bf16.mxu0 %v687_v0 }
  0x71   :  { %550 = vmatpush3.bf16.msra.mxu0 %v549_v61 }
 0x127   :  { %v162_v55 = vpop.f32.mrb[0].mxu0 }
 0x128   :  { %v163_v56 = vadd.f32 %v373_v54, %v162_v55  ;;  %v426_v57 = vpop.f32.mrb[1].mxu0 }
 0x12a   :  { %v166_v58 = vmax.f32 %v163_v56, 0.0 }
 0x12c   :  { %460 = vmatmul.mubr.f32.vlgmr.msra.gmra.mrb[0].mxu1 %v166_v58 }
 0x1ff   :  { %v256_v63 = vpop.f32.mrb[0].mxu1 }
 0x200   :  { %v257_v1 = vadd.f32 %v375_v62, %v256_v63  ;;  %v461_v0 = vpop.f32.mrb[1].mxu1 }
 0x202   :  { %v260_v2 = vmax.f32 %v257_v1, 0.0 }
 0x204   :  { %495 = vmatmul.mubr.f32.vlgmr.msra.gmra.mrb[2].mxu0 %v260_v2 }
 0x2d7   :  { %v350_v4 = vpop.f32.mrb[2].mxu0 }
 0x2d8   :  { %v351_v5 = vadd.f32 %v376_v3, %v350_v4  ;;  %v496_v6 = vpop.f32.mrb[3].mxu0 }
 0x2da   :  { %561 = vtanh.f32 %v351_v5 }
 0x2e4   :  { %v562_v7 = vpop.eup %561 }
 0x2e5   :  { %355 = vst [vmem:[#allocation10] sm:$0xff] %v562_v7 }
 0x2e6   :  { %662 = shalt.err (!%p659_p8)
}
 0x2e7   :  { %s663_s6 = scalar_lea.hbm %s837_s7, 128 }
 0x2e8   :  { %p664_p9 = scmp.ne.s32.totalorder %s837_s7, %s663_s6  ;;  %p667_p10 = scmp.lt.u32.totalorder %s663_s6, %s837_s7 }
 0x2ea   :  { %p669_p11 = pnand %p667_p10, %p664_p9 }
 0x2ec   :  { %672 = shalt.err (!%p669_p11)
}
 0x2ed   :  { %365 = dma.vmem_to_hbm [thread:$0]  %s363_s29, 128, %s837_s7, [#allocation4]  }
 0x2ee   :  { %679 = dma.done.wait [#allocation4], 128  }
 0x2ef   :  { %680 = vsyncadd [#allocation4], 4294967168 }
 0x2f0   :  { %369 = vsyncpa [#allocation3], 1 }
 0x2f1   :  { %370 = vsyncpa [#allocation6], 1 }
 0x2f2   :  { %371 = vsyncpa [#allocation9], 1 }
 0x2f3   :  { %372 = vsyncpa [#allocation4], 1 }

</bundles_post_ra>
